<compile_context>
chip_gen: v7x
topology: tpu7x:2x2x1
jax: 0.10.0
libtpu: 0.0.40
codegen_flags: <defaults>
</compile_context>

<pallas_src>
import jax
import jax.numpy as jnp
from jax.experimental import pallas as pl
from jax.experimental.pallas import tpu as pltpu


def decoder_kernel(x_ref,
                   w1_ref, b1_ref,
                   w2_ref, b2_ref,
                   w3_ref, b3_ref,
                   w4_ref, b4_ref,
                   out_ref):
    """One grid step == one batch tile (TM rows), all four layers fused.

    x_ref  : (TM, 512)        flattened input rows
    wK_ref : (in_f, out_f)    layer-K weight, already transposed to (in, out)
    bK_ref : (1, out_f)       layer-K bias
    out_ref: (TM, in_size)    sigmoid output
    """
    x = x_ref[...].astype(jnp.float32)

    h = jnp.dot(x, w1_ref[...], preferred_element_type=jnp.float32)
    h = jnp.maximum(h + b1_ref[...], 0.0)

    h = jnp.dot(h, w2_ref[...], preferred_element_type=jnp.float32)
    h = jnp.maximum(h + b2_ref[...], 0.0)

    h = jnp.dot(h, w3_ref[...], preferred_element_type=jnp.float32)
    h = jnp.maximum(h + b3_ref[...], 0.0)

    z = jnp.dot(h, w4_ref[...], preferred_element_type=jnp.float32)
    z = z + b4_ref[...]

    out_ref[...] = jax.nn.sigmoid(z).astype(out_ref.dtype)


def decoder_forward(x, params, *, tm=8):
    """x: (B, ...) flattened to (B, 512); params: list of (W_t, b) per layer,
    W_t shaped (in_features, out_features), b shaped (1, out_features)."""
    B = x.shape[0]
    x2 = x.reshape(B, -1).astype(jnp.float32)
    d_in = x2.shape[1]

    (w1, b1), (w2, b2), (w3, b3), (w4, b4) = params
    out_dim = w4.shape[1]

    # Pad the batch to a multiple of the tile so the grid is exact.
    n_tiles = pl.cdiv(B, tm)
    Bp = n_tiles * tm
    if Bp != B:
        x2 = jnp.pad(x2, ((0, Bp - B), (0, 0)))

    full = lambda m: (0, 0)           # weights/biases: one resident block
    rows = lambda m: (m, 0)           # activations: tile along batch

    out = pl.pallas_call(
        decoder_kernel,
        out_shape=jax.ShapeDtypeStruct((Bp, out_dim), jnp.float32),
        grid_spec=pltpu.PrefetchScalarGridSpec(
            num_scalar_prefetch=0,
            grid=(n_tiles,),
            in_specs=[
                pl.BlockSpec((tm, d_in), rows),
                pl.BlockSpec(w1.shape, full), pl.BlockSpec(b1.shape, full),
                pl.BlockSpec(w2.shape, full), pl.BlockSpec(b2.shape, full),
                pl.BlockSpec(w3.shape, full), pl.BlockSpec(b3.shape, full),
                pl.BlockSpec(w4.shape, full), pl.BlockSpec(b4.shape, full),
            ],
            out_specs=pl.BlockSpec((tm, out_dim), rows),
        ),
        compiler_params=pltpu.CompilerParams(
            # batch tiles are independent -> megacore shards them on v7x
            dimension_semantics=("parallel",),
            vmem_limit_bytes=32 * 1024 * 1024,
        ),
    )(x2, w1, b1, w2, b2, w3, b3, w4, b4)

    return out[:B]


def reference_forward(x, params):
    """Pure-JAX reference matching the PyTorch Decoder.forward."""
    h = x.reshape(x.shape[0], -1).astype(jnp.float32)
    (w1, b1), (w2, b2), (w3, b3), (w4, b4) = params
    h = jax.nn.relu(h @ w1 + b1)
    h = jax.nn.relu(h @ w2 + b2)
    h = jax.nn.relu(h @ w3 + b3)
    return jax.nn.sigmoid(h @ w4 + b4)


if __name__ == "__main__":
    # Small shapes consistent with the module: the first Linear hard-codes
    # 512 input features; pick hidden_dim=256, in_size=128 (lane-dense dims).
    B = 16
    D_IN = 512            # fixed by nn.Linear(512, hidden_dim)
    HIDDEN = 256          # hidden_dim
    IN_SIZE = 128         # in_size (== output width)

    key = jax.random.PRNGKey(0)
    kx, k1, k2, k3, k4, kb1, kb2, kb3, kb4 = jax.random.split(key, 9)

    # Input mirrors the PyTorch reshape: (B, 8, 64) -> flattened to (B, 512).
    x = jax.random.normal(kx, (B, 8, 64), dtype=jnp.float32)

    layer_dims = [(D_IN, HIDDEN), (HIDDEN, HIDDEN // 2),
                  (HIDDEN // 2, IN_SIZE), (IN_SIZE, IN_SIZE)]
    wkeys = [k1, k2, k3, k4]
    bkeys = [kb1, kb2, kb3, kb4]

    # Weights stored as (in_features, out_features) == PyTorch W.T, biases (1, out).
    params = []
    for (din, dout), kw, kb in zip(layer_dims, wkeys, bkeys):
        w = 0.05 * jax.random.normal(kw, (din, dout), dtype=jnp.float32)
        b = 0.05 * jax.random.normal(kb, (1, dout), dtype=jnp.float32)
        params.append((w, b))

    out = decoder_forward(x, params, tm=8)
    out = jax.block_until_ready(out)

    ref = jax.block_until_ready(reference_forward(x, params))

    assert out.shape == (B, IN_SIZE) and out.dtype == jnp.float32
    assert jnp.allclose(out, ref, rtol=1e-5, atol=1e-5), (
        float(jnp.max(jnp.abs(out - ref))))

    print("KERNEL_OK")
</pallas_src>

<mosaic_0001>
module attributes {stable_mosaic.version = 11 : i64} {
  func.func @decoder_kernel(%arg0: i32, %arg1: memref<8x512xf32, #tpu.memory_space<vmem>>, %arg2: memref<512x256xf32, #tpu.memory_space<vmem>>, %arg3: memref<1x256xf32, #tpu.memory_space<vmem>>, %arg4: memref<256x128xf32, #tpu.memory_space<vmem>>, %arg5: memref<1x128xf32, #tpu.memory_space<vmem>>, %arg6: memref<128x128xf32, #tpu.memory_space<vmem>>, %arg7: memref<1x128xf32, #tpu.memory_space<vmem>>, %arg8: memref<128x128xf32, #tpu.memory_space<vmem>>, %arg9: memref<1x128xf32, #tpu.memory_space<vmem>>, %arg10: memref<8x128xf32, #tpu.memory_space<vmem>>) attributes {dimension_semantics = [#tpu.dimension_semantics<parallel>], iteration_bounds = array<i64: 2>, scalar_prefetch = 0 : i64, scratch_operands = 0 : i64, tpu.core_type = #tpu.core_type<tc>, window_params = [{transform_indices = @transform_0, window_bounds = array<i64: 8, 512>}, {pipeline_mode = #tpu.pipeline_mode<synchronous>, transform_indices = @transform_1, window_bounds = array<i64: 512, 256>}, {pipeline_mode = #tpu.pipeline_mode<synchronous>, transform_indices = @transform_2, window_bounds = array<i64: 1, 256>}, {pipeline_mode = #tpu.pipeline_mode<synchronous>, transform_indices = @transform_3, window_bounds = array<i64: 256, 128>}, {pipeline_mode = #tpu.pipeline_mode<synchronous>, transform_indices = @transform_4, window_bounds = array<i64: 1, 128>}, {pipeline_mode = #tpu.pipeline_mode<synchronous>, transform_indices = @transform_5, window_bounds = array<i64: 128, 128>}, {pipeline_mode = #tpu.pipeline_mode<synchronous>, transform_indices = @transform_6, window_bounds = array<i64: 1, 128>}, {pipeline_mode = #tpu.pipeline_mode<synchronous>, transform_indices = @transform_7, window_bounds = array<i64: 128, 128>}, {pipeline_mode = #tpu.pipeline_mode<synchronous>, transform_indices = @transform_8, window_bounds = array<i64: 1, 128>}, {transform_indices = @transform_9, window_bounds = array<i64: 8, 128>}]} {
    %c0 = arith.constant 0 : index
    %c0_0 = arith.constant 0 : index
    %0 = vector.load %arg1[%c0, %c0_0] : memref<8x512xf32, #tpu.memory_space<vmem>>, vector<8x512xf32>
    %c0_1 = arith.constant 0 : index
    %c0_2 = arith.constant 0 : index
    %1 = vector.load %arg2[%c0_1, %c0_2] : memref<512x256xf32, #tpu.memory_space<vmem>>, vector<512x256xf32>
    %cst = arith.constant dense<0.000000e+00> : vector<8x256xf32>
    %2 = tpu.matmul %0, %1, %cst {dimension_numbers = #tpu.dot_dimension_numbers<[1], [0], [0], [1], [0, 0, 1, 1], [], []>} : vector<8x512xf32>, vector<512x256xf32>, vector<8x256xf32> -> vector<8x256xf32>
    %c0_3 = arith.constant 0 : index
    %c0_4 = arith.constant 0 : index
    %3 = vector.load %arg3[%c0_3, %c0_4] : memref<1x256xf32, #tpu.memory_space<vmem>>, vector<1x256xf32>
    %4 = vector.broadcast %3 : vector<1x256xf32> to vector<8x256xf32>
    %5 = arith.addf %2, %4 : vector<8x256xf32>
    %cst_5 = arith.constant 0.000000e+00 : f32
    %6 = vector.broadcast %cst_5 : f32 to vector<8x256xf32>
    %7 = arith.maximumf %5, %6 : vector<8x256xf32>
    %c0_6 = arith.constant 0 : index
    %c0_7 = arith.constant 0 : index
    %8 = vector.load %arg4[%c0_6, %c0_7] : memref<256x128xf32, #tpu.memory_space<vmem>>, vector<256x128xf32>
    %cst_8 = arith.constant dense<0.000000e+00> : vector<8x128xf32>
    %9 = tpu.matmul %7, %8, %cst_8 {dimension_numbers = #tpu.dot_dimension_numbers<[1], [0], [0], [1], [0, 0, 1, 1], [], []>} : vector<8x256xf32>, vector<256x128xf32>, vector<8x128xf32> -> vector<8x128xf32>
    %c0_9 = arith.constant 0 : index
    %c0_10 = arith.constant 0 : index
    %10 = vector.load %arg5[%c0_9, %c0_10] : memref<1x128xf32, #tpu.memory_space<vmem>>, vector<1x128xf32>
    %11 = vector.broadcast %10 : vector<1x128xf32> to vector<8x128xf32>
    %12 = arith.addf %9, %11 : vector<8x128xf32>
    %cst_11 = arith.constant 0.000000e+00 : f32
    %13 = vector.broadcast %cst_11 : f32 to vector<8x128xf32>
    %14 = arith.maximumf %12, %13 : vector<8x128xf32>
    %c0_12 = arith.constant 0 : index
    %c0_13 = arith.constant 0 : index
    %15 = vector.load %arg6[%c0_12, %c0_13] : memref<128x128xf32, #tpu.memory_space<vmem>>, vector<128x128xf32>
    %cst_14 = arith.constant dense<0.000000e+00> : vector<8x128xf32>
    %16 = tpu.matmul %14, %15, %cst_14 {dimension_numbers = #tpu.dot_dimension_numbers<[1], [0], [0], [1], [0, 0, 1, 1], [], []>} : vector<8x128xf32>, vector<128x128xf32>, vector<8x128xf32> -> vector<8x128xf32>
    %c0_15 = arith.constant 0 : index
    %c0_16 = arith.constant 0 : index
    %17 = vector.load %arg7[%c0_15, %c0_16] : memref<1x128xf32, #tpu.memory_space<vmem>>, vector<1x128xf32>
    %18 = vector.broadcast %17 : vector<1x128xf32> to vector<8x128xf32>
    %19 = arith.addf %16, %18 : vector<8x128xf32>
    %cst_17 = arith.constant 0.000000e+00 : f32
    %20 = vector.broadcast %cst_17 : f32 to vector<8x128xf32>
    %21 = arith.maximumf %19, %20 : vector<8x128xf32>
    %c0_18 = arith.constant 0 : index
    %c0_19 = arith.constant 0 : index
    %22 = vector.load %arg8[%c0_18, %c0_19] : memref<128x128xf32, #tpu.memory_space<vmem>>, vector<128x128xf32>
    %cst_20 = arith.constant dense<0.000000e+00> : vector<8x128xf32>
    %23 = tpu.matmul %21, %22, %cst_20 {dimension_numbers = #tpu.dot_dimension_numbers<[1], [0], [0], [1], [0, 0, 1, 1], [], []>} : vector<8x128xf32>, vector<128x128xf32>, vector<8x128xf32> -> vector<8x128xf32>
    %c0_21 = arith.constant 0 : index
    %c0_22 = arith.constant 0 : index
    %24 = vector.load %arg9[%c0_21, %c0_22] : memref<1x128xf32, #tpu.memory_space<vmem>>, vector<1x128xf32>
    %25 = vector.broadcast %24 : vector<1x128xf32> to vector<8x128xf32>
    %26 = arith.addf %23, %25 : vector<8x128xf32>
    %27 = arith.negf %26 : vector<8x128xf32>
    %28 = math.exp %27 : vector<8x128xf32>
    %cst_23 = arith.constant 1.000000e+00 : f32
    %29 = vector.broadcast %cst_23 : f32 to vector<8x128xf32>
    %30 = arith.addf %29, %28 : vector<8x128xf32>
    %31 = arith.divf %29, %30 : vector<8x128xf32>
    %c0_24 = arith.constant 0 : index
    %c0_25 = arith.constant 0 : index
    %32 = vector.load %arg10[%c0_24, %c0_25] : memref<8x128xf32, #tpu.memory_space<vmem>>, vector<8x128xf32>
    tpu.vector_store %arg10[%c0_24, %c0_25], %31 {strides = array<i32>} : memref<8x128xf32, #tpu.memory_space<vmem>>, vector<8x128xf32>,
    return
  }
  func.func @transform_0(%arg0: i32) -> (i32, i32) {
    %c0_i32 = arith.constant 0 : i32
    %c0_i32_0 = arith.constant 0 : i32
    return %arg0, %c0_i32 : i32, i32
  }
  func.func @transform_1(%arg0: i32) -> (i32, i32) {
    %c0_i32 = arith.constant 0 : i32
    %c0_i32_0 = arith.constant 0 : i32
    %c0_i32_1 = arith.constant 0 : i32
    return %c0_i32, %c0_i32_0 : i32, i32
  }
  func.func @transform_2(%arg0: i32) -> (i32, i32) {
    %c0_i32 = arith.constant 0 : i32
    %c0_i32_0 = arith.constant 0 : i32
    %c0_i32_1 = arith.constant 0 : i32
    return %c0_i32, %c0_i32_0 : i32, i32
  }
  func.func @transform_3(%arg0: i32) -> (i32, i32) {
    %c0_i32 = arith.constant 0 : i32
    %c0_i32_0 = arith.constant 0 : i32
    %c0_i32_1 = arith.constant 0 : i32
    return %c0_i32, %c0_i32_0 : i32, i32
  }
  func.func @transform_4(%arg0: i32) -> (i32, i32) {
    %c0_i32 = arith.constant 0 : i32
    %c0_i32_0 = arith.constant 0 : i32
    %c0_i32_1 = arith.constant 0 : i32
    return %c0_i32, %c0_i32_0 : i32, i32
  }
  func.func @transform_5(%arg0: i32) -> (i32, i32) {
    %c0_i32 = arith.constant 0 : i32
    %c0_i32_0 = arith.constant 0 : i32
    %c0_i32_1 = arith.constant 0 : i32
    return %c0_i32, %c0_i32_0 : i32, i32
  }
  func.func @transform_6(%arg0: i32) -> (i32, i32) {
    %c0_i32 = arith.constant 0 : i32
    %c0_i32_0 = arith.constant 0 : i32
    %c0_i32_1 = arith.constant 0 : i32
    return %c0_i32, %c0_i32_0 : i32, i32
  }
  func.func @transform_7(%arg0: i32) -> (i32, i32) {
    %c0_i32 = arith.constant 0 : i32
    %c0_i32_0 = arith.constant 0 : i32
    %c0_i32_1 = arith.constant 0 : i32
    return %c0_i32, %c0_i32_0 : i32, i32
  }
  func.func @transform_8(%arg0: i32) -> (i32, i32) {
    %c0_i32 = arith.constant 0 : i32
    %c0_i32_0 = arith.constant 0 : i32
    %c0_i32_1 = arith.constant 0 : i32
    return %c0_i32, %c0_i32_0 : i32, i32
  }
  func.func @transform_9(%arg0: i32) -> (i32, i32) {
    %c0_i32 = arith.constant 0 : i32
    %c0_i32_0 = arith.constant 0 : i32
    return %arg0, %c0_i32 : i32, i32
  }
}

</mosaic_0001>

<bundles_post_ra>
// kernel: tpu_custom_call.1
= control target key start
LH: loop header
LB: loop body
LE: loop exit
PB: predicated region body
PF: predicated region fallthrough
CT: control target
= control target key end

     0   :  { %s2199_s0 = inlined_call_operand.hbm [shape: f32[16,512], index: 0, kind: input, shape index: {}]   ;;  %s2200_s1 = inlined_call_operand.hbm [shape: f32[512,256], index: 1, kind: input, shape index: {}]   ;;  %s2201_s2 = inlined_call_operand.vmem [shape: f32[1,256], index: 2, kind: input, shape index: {}]   ;;  %s2202_s3 = inlined_call_operand.hbm [shape: f32[256,128], index: 3, kind: input, shape index: {}]   ;;  %s2203_s4 = inlined_call_operand.vmem [shape: f32[1,128], index: 4, kind: input, shape index: {}]   ;;  %s2204_s5 = inlined_call_operand.hbm [shape: f32[128,128], index: 5, kind: input, shape index: {}]   ;;  %s2205_s6 = inlined_call_operand.vmem [shape: f32[1,128], index: 6, kind: input, shape index: {}]   ;;  %s2206_s7 = inlined_call_operand.hbm [shape: f32[128,128], index: 7, kind: input, shape index: {}]   ;;  %s2207_s8 = inlined_call_operand.vmem [shape: f32[1,128], index: 8, kind: input, shape index: {}]   ;;  %s2208_s9 = inlined_call_operand.hbm [shape: f32[16,128], index: 9, kind: output, shape index: {}]  }
   0x1   :  { %2213 = sst [smem:[#allocation16_spill]] %s2200_s1 }
   0x2   :  { %2214 = sst [smem:[#allocation17_spill]] %s2208_s9 }
   0x3   :  { %14 = vsyncpa [#allocation3], 0 }
   0x4   :  { %16 = vsyncpa [#allocation3 + $0x1], 0 }
   0x5   :  { %17 = vsyncpa [#allocation6], 0 }
   0x6   :  { %18 = vsyncpa [#allocation9], 0 }
   0x7   :  { %19 = vsyncpa [#allocation4], 0 }
   0x8   :  { %21 = vsyncpa [#allocation4 + $0x1], 0  ;;  %s1877_s30 = smov 0   ;;  %s1879_s10 = smov 0  }
   0x9   :  { %s1881_s11 = smov 0   ;;  %s1883_s12 = smov 0  }
   0xa LB: > { %s1814_s13 = smov [#allocation5]   ;;  %s1898_s15 = sadd.s32 4294967295, %s1812_s12   ;;  %s1812_s12 = sphi %s1883_s12, %s2237_s12   ;;  %s1808_s11 = sphi %s1881_s11, %s2236_s11   ;;  %s1804_s10 = sphi %s1879_s10, %s2235_s10   ;;  %s1800_s30 = sphi %s1877_s30, %s2234_s30  }
   0xb   : > { %s264_s14 = sshll.u32 %s1814_s13, 4  ;;  %p1122_p0 = scmp.ge.s32.totalorder %s1812_s12, 1  ;;  %s1903_s14 = int_to_ptr.vmem [resolvable:$true] %s264_s14 }
   0xc   : > { %p2210_p1 = scmp.eq.s32.totalorder %s1898_s15, 0  ;;  %p252_p2 = scmp.lt.s32.totalorder %s1812_s12, 3 }
   0xd   : > { %s1815_s18 = smov [#allocation8]   ;;  %s1816_s20 = smov [#allocation7]  }
   0xe   : > { %p1905_p3 = pnand %p1122_p0, %p252_p2  ;;  %s296_s19 = sshll.u32 %s1815_s18, 4  ;;  %s1918_s19 = int_to_ptr.vmem [resolvable:$true] %s296_s19 }
   0xf   : > { %s1920_s21 = sshll.u32 %s1816_s20, 4  ;;  %s2217_s1 = sld [smem:[#allocation16_spill]]  ;;  %s281_s21 = int_to_ptr.vmem [resolvable:$true] %s1920_s21 }
  0x10   : > { %s2215_s16 = scalar_select %p1905_p3, 1, 0 }
  0x11   : > { %p1518_p5 = pneg %p1905_p3 }
  0x13   : > { %p1914_p6 = pnand %p1518_p5, %p2210_p1 }
  0x15   : > { %s1596_s24 = scalar_lea.hbm %s2217_s1, 16384  ;;  %p1930_p8 = pneg %p1914_p6 }
  0x16   : > { %p1597_p7 = scmp.ne.s32.totalorder %s2217_s1, %s1596_s24  ;;  %p1603_p11 = scmp.lt.u32.totalorder %s1596_s24, %s2217_s1 }
  0x18   : > { %p1599_p9 = pnand %p1930_p8, %p1597_p7 }
  0x1a   : > { %p1600_p10 = pneg %p1599_p9 }
  0x1c   : > { %p1605_p12 = pnand %p1603_p11, %p1600_p10 }
  0x1e   : > { %1608 = shalt.err (!%p1605_p12)
}
  0x1f   : > { %s1609_s13 = scalar_lea.vmem %s1903_s14, 16384  ;;  %p1617_p5 = scmp.lt.s32.totalorder %s1903_s14, %s1903_s14 }
  0x20   : > { %p1610_p13 = scmp.ne.s32.totalorder %s1903_s14, %s1609_s13  ;;  %p1618_p4 = scmp.lt.s32.totalorder %s1609_s13, %s1609_s13 }
  0x22   : > { %p1612_p0 = pnand %p1610_p13, %p1930_p8  ;;  %p1619_p7 = por %p1618_p4, %p1617_p5 }
  0x24   : > { %p1613_p2 = pneg %p1612_p0 }
  0x26   : > { %p1620_p9 = pnand %p1619_p7, %p1613_p2 }
  0x28   : > { %1623 = shalt.err (!%p1620_p9)
}
  0x29   : > { %s1817_s18 = smov 256   ;;  %s1818_s20 = smov 16  }
  0x2a   : > { %1521 = dma.hbm_to_vmem [thread:$0]  (!%p1914_p6), %s2217_s1, 16384, %s1903_s14, [#allocation6], %s1817_s18, %s1817_s18, %s1818_s20  }
  0x2b   : > { %s1624_s26 = scalar_lea.hbm %s2204_s5, 2048 }
  0x2c   : > { %p1625_p4 = scmp.ne.s32.totalorder %s2204_s5, %s1624_s26  ;;  %p1631_p12 = scmp.lt.u32.totalorder %s1624_s26, %s2204_s5 }
  0x2e   : > { %p1627_p10 = pnand %p1625_p4, %p1930_p8 }
  0x30   : > { %p1628_p11 = pneg %p1627_p10 }
  0x32   : > { %p1633_p13 = pnand %p1631_p12, %p1628_p11 }
  0x34   : > { %1636 = shalt.err (!%p1633_p13)
}
  0x35   : > { %s1637_s14 = scalar_lea.vmem %s1918_s19, 2048  ;;  %p1645_p7 = scmp.lt.s32.totalorder %s1918_s19, %s1918_s19 }
  0x36   : > { %p1638_p0 = scmp.ne.s32.totalorder %s1918_s19, %s1637_s14  ;;  %p1646_p9 = scmp.lt.s32.totalorder %s1637_s14, %s1637_s14 }
  0x38   : > { %p1640_p2 = pnand %p1638_p0, %p1930_p8  ;;  %p1647_p4 = por %p1646_p9, %p1645_p7 }
  0x3a   : > { %p1641_p5 = pneg %p1640_p2 }
  0x3c   : > { %p1648_p10 = pnand %p1647_p4, %p1641_p5 }
  0x3e   : > { %1651 = shalt.err (!%p1648_p10)
}
  0x3f   : > { %s1819_s18 = smov 128   ;;  %s1820_s9 = smov 8  }
  0x40   : > { %1527 = dma.hbm_to_vmem [thread:$0]  (!%p1914_p6), %s2204_s5, 2048, %s1918_s19, [#allocation9], %s1819_s18, %s1819_s18, %s1820_s9  }
  0x41   : > { %s1652_s25 = scalar_lea.hbm %s2202_s3, 4096 }
  0x42   : > { %p1653_p11 = scmp.ne.s32.totalorder %s2202_s3, %s1652_s25  ;;  %p1659_p0 = scmp.lt.u32.totalorder %s1652_s25, %s2202_s3 }
  0x44   : > { %p1655_p12 = pnand %p1653_p11, %p1930_p8 }
  0x46   : > { %p1656_p13 = pneg %p1655_p12 }
  0x48   : > { %p1661_p2 = pnand %p1659_p0, %p1656_p13 }
  0x4a   : > { %1664 = shalt.err (!%p1661_p2)
}
  0x4b   : > { %s1665_s14 = scalar_lea.vmem %s281_s21, 4096  ;;  %p1673_p4 = scmp.lt.s32.totalorder %s281_s21, %s281_s21 }
  0x4c   : > { %p1666_p5 = scmp.ne.s32.totalorder %s281_s21, %s1665_s14  ;;  %p1674_p10 = scmp.lt.s32.totalorder %s1665_s14, %s1665_s14 }
  0x4e   : > { %p1668_p7 = pnand %p1666_p5, %p1930_p8  ;;  %p1675_p1 = por %p1674_p10, %p1673_p4 }
  0x50   : > { %p1669_p9 = pneg %p1668_p7 }
  0x52   : > { %p1676_p3 = pnand %p1675_p1, %p1669_p9 }
  0x54   : > { %1679 = shalt.err (!%p1676_p3)
}
  0x55   : > { %1524 = dma.hbm_to_vmem [thread:$0]  (!%p1914_p6), %s2202_s3, 4096, %s281_s21, [#allocation6], %s1819_s18, %s1819_s18, %s1820_s9  }
  0x56   : > { %s1821_s22 = smov [#allocation10]   ;;  %s1680_s26 = scalar_lea.hbm %s2206_s7, 2048 }
  0x57   : > { %s312_s23 = sshll.u32 %s1821_s22, 4  ;;  %p1681_p1 = scmp.ne.s32.totalorder %s2206_s7, %s1680_s26  ;;  %s313_s23 = int_to_ptr.vmem [resolvable:$true] %s312_s23 }
  0x58   : > { %p1687_p12 = scmp.lt.u32.totalorder %s1680_s26, %s2206_s7 }
  0x59   : > { %p1683_p3 = pnand %p1681_p1, %p1930_p8 }
  0x5b   : > { %p1684_p11 = pneg %p1683_p3 }
  0x5d   : > { %p1689_p13 = pnand %p1687_p12, %p1684_p11 }
  0x5f   : > { %1692 = shalt.err (!%p1689_p13)
}
  0x60   : > { %s1693_s21 = scalar_lea.vmem %s313_s23, 2048  ;;  %p1701_p7 = scmp.lt.s32.totalorder %s313_s23, %s313_s23 }
  0x61   : > { %p1694_p0 = scmp.ne.s32.totalorder %s313_s23, %s1693_s21  ;;  %p1702_p9 = scmp.lt.s32.totalorder %s1693_s21, %s1693_s21 }
  0x63   : > { %p1696_p2 = pnand %p1694_p0, %p1930_p8  ;;  %p1703_p4 = por %p1702_p9, %p1701_p7 }
  0x65   : > { %p1697_p5 = pneg %p1696_p2 }
  0x67   : > { %p1704_p10 = pnand %p1703_p4, %p1697_p5 }
  0x69   : > { %1707 = shalt.err (!%p1704_p10)
}
  0x6a   : > { %1530 = dma.hbm_to_vmem [thread:$0]  (!%p1914_p6), %s2206_s7, 2048, %s313_s23, [#allocation9], %s1819_s18, %s1819_s18, %s1820_s9  }
  0x6b   : > { %s1121_s17 = sadd.s32 4294967294, %s1812_s12   ;;  %s2022_s27 = sadd.s32 1, %s1812_s12  }
  0x6c   : > { %s31_s22 = ssub.s32 %s1812_s12, %s2022_s27  ;;  %s34_s24 = sadd.s32 1, %s1808_s11 }
  0x6d   : > { %p32_p8 = scmp.eq.s32.totalorder %s31_s22, 0  ;;  %p41_p1 = scmp.ne.s32.totalorder %s1808_s11, %s1804_s10 }
  0x6e   : > { %p42_p3 = scmp.eq.s32.totalorder %s1812_s12, 0  ;;  %p47_p11 = scmp.ne.s32.totalorder %s1804_s10, %s1800_s30 }
  0x6f   : > { %s2033_s25 = scalar_select %p32_p8, %s1808_s11, %s34_s24  }
  0x70   : > { %p2035_p12 = por %p42_p3, %p41_p1  ;;  %p2220_p13 = scmp.eq.s32.totalorder %s1898_s15, 0 }
  0x71   : > { %p239_p0 = scmp.eq.s32.totalorder %s1898_s15, 1  ;;  %p245_p2 = scmp.eq.s32.totalorder %s1121_s17, 1 }
  0x72   : > { %p2041_p6 = por %p2220_p13, %p47_p11  ;;  %p1543_p5 = scmp.lt.s32.totalorder %s1812_s12, 2 }
  0x73   : > { %s329_s9 = sand.u32 1, %s1808_s11   ;;  %p2048_p7 = por %p239_p0, %p41_p1 }
  0x74   : > { %p2052_p9 = por %p245_p2, %p47_p11  ;;  %s1128_s29 = sshll.u32 %s329_s9, 5 }
  0x75   : > { %s2222_s23 = scalar_select %p2048_p7, 1, 0 }
  0x76   : > { %s2223_s28 = scalar_select %p2052_p9, 1, 0 }
  0x77   : > { %s1146_s13 = sshll.u32 %s1812_s12, 9  ;;  %s333_s20 = scalar_lea.vmem [#allocation2], %s1128_s29 }
  0x78   : > { %s2060_s19 = scalar_lea.hbm %s2199_s0, %s1146_s13  ;;  %s341_s17 = sshll.u32 %s333_s20, 4  ;;  %s2062_s17 = int_to_ptr.vmem [resolvable:$true] %s341_s17 }
  0x79   : > { %p2066_p4 = pnand %p1543_p5, %p2035_p12  ;;  %s330_s24 = scalar_lea.sflag [#allocation3], %s329_s9 }
  0x7a   : > { %s1708_s1 = scalar_lea.hbm %s2060_s19, 512  ;;  %s1713_s14 = scalar_lea.hbm %s2199_s0, 1024 }
  0x7b   : > { %p1709_p10 = scmp.ne.s32.totalorder %s2060_s19, %s1708_s1  ;;  %p1710_p8 = pneg %p2066_p4 }
  0x7c   : > { %p1714_p11 = scmp.lt.u32.totalorder %s2060_s19, %s2199_s0  ;;  %p1715_p12 = scmp.lt.u32.totalorder %s1713_s14, %s1708_s1 }
  0x7d   : > { %p1711_p1 = pnand %p1710_p8, %p1709_p10  ;;  %p1717_p0 = scmp.lt.u32.totalorder %s1708_s1, %s2060_s19 }
  0x7e   : > { %p1716_p13 = por %p1715_p12, %p1714_p11 }
  0x7f   : > { %p1712_p3 = pneg %p1711_p1 }
  0x80   : > { %p1718_p2 = por %p1717_p0, %p1716_p13 }
  0x82   : > { %p1719_p5 = pnand %p1718_p2, %p1712_p3 }
  0x84   : > { %1722 = shalt.err (!%p1719_p5)
}
  0x85   : > { %s1723_s9 = scalar_lea.vmem %s2062_s17, 512  ;;  %s1822_s20 = smov [#allocation2]  }
  0x86   : > { %p1724_p10 = scmp.ne.s32.totalorder %s2062_s17, %s1723_s9  ;;  %s1728_s29 = sshll.u32 %s1822_s20, 4  ;;  %s1729_s29 = int_to_ptr.vmem [resolvable:$false] %s1728_s29 }
  0x87   : > { %s1730_s13 = scalar_lea.vmem %s1729_s29, 1024  ;;  %p1731_p7 = scmp.lt.s32.totalorder %s2062_s17, %s1729_s29 }
  0x88   : > { %p1726_p1 = pnand %p1724_p10, %p1710_p8  ;;  %p1732_p11 = scmp.lt.s32.totalorder %s1730_s13, %s1723_s9 }
  0x8a   : > { %p1727_p9 = pneg %p1726_p1  ;;  %p1733_p12 = por %p1732_p11, %p1731_p7 }
  0x8c   : > { %p1734_p13 = pnand %p1733_p12, %p1727_p9 }
  0x8e   : > { %1737 = shalt.err (!%p1734_p13)
}
  0x8f   : > { %1534 = dma.hbm_to_vmem [thread:$0]  (!%p2066_p4), %s2060_s19, 512, %s2062_s17, %s330_s24  }
  0x90   : > { %p2225_p3 = scmp.ne.s32.totalorder %s2215_s16, 0 }
  0x91   : > { %s2098_s1 = sand.u32 (!%p2225_p3), 1, %s1804_s10  }
  0x92   : > { %350 = sbr.rel (%p2225_p3) target bundleno = 1198 (0x4ae), region = 56  ;;  %s1132_s14 = sshll.u32 (!%p2225_p3), %s2098_s1, 5 }
  0x93   : > { %s353_s26 = scalar_lea.sflag (!%p2225_p3), [#allocation3], %s2098_s1  ;;  %s2102_s21 = scalar_lea.vmem (!%p2225_p3), [#allocation2], %s1132_s14 }
  0x99   : > { %1783 = dma.done.wait (%p2041_p6), %s353_s26, 512  }
  0x9a   : > { %1785 = vsyncadd (%p2041_p6), %s353_s26, 4294966784  ;;  %p2226_p7 = scmp.eq.s32.totalorder %s1898_s15, 0 }
  0x9c   : > { %1787 = dma.done.wait (%p2226_p7), [#allocation6], 20480   ;;  %p2227_p9 = pmov %p2226_p7 }
  0x9d   : > { %p2228_p4 = pmov %p2226_p7 }
  0x9e   : > { %1789 = vsyncadd (%p2227_p9), [#allocation6], 4294946816 }
  0x9f   : > { %1791 = dma.done.wait (%p2228_p4), [#allocation9], 4096   ;;  %p2229_p8 = pmov %p2228_p4 }
  0xa0   : > { %v412_v0 = vld [vmem:[#allocation5 + $0x8] sm:$0xff]  ;;  %v414_v1 = vld [vmem:[#allocation5 + $0x18] sm:$0xff]  ;;  %v411_v2 = vld [vmem:[#allocation5] sm:$0xff]  ;;  %vm1824_vm0 = vmmov 0   ;;  %s1137_s29 = sshll.u32 %s2098_s1, 3  ;;  %s1143_s13 = sshll.u32 %s1898_s15, 7 }
  0xa1   : > { %1793 = vsyncadd (%p2229_p8), [#allocation9], 4294963200  ;;  %v1286_v3 = vpack.c.bf16 %v414_v1, %v412_v0  ;;  %v413_v4 = vld [vmem:[#allocation5 + $0x10] sm:$0xff]  ;;  %v416_v5 = vld [vmem:[#allocation5 + $0x28] sm:$0xff]  ;;  %s406_s14 = scalar_lea.vmem [#allocation11], %s1137_s29  ;;  %s2230_s18 = sld [smem:[#allocation17_spill]] }
  0xa2   : > { %v418_v6 = vld [vmem:[#allocation5 + $0x38] sm:$0xff]  ;;  %v1288_v7 = vpack.c.bf16 %v413_v4, %v411_v2  ;;  %v415_v9 = vld [vmem:[#allocation5 + $0x20] sm:$0xff]  ;;  %v417_v10 = vld [vmem:[#allocation5 + $0x30] sm:$0xff]  ;;  %s1013_s26 = sshll.u32 %s406_s14, 4  ;;  %s1000_s17 = scalar_lea.sflag [#allocation4], %s2098_s1  ;;  %s2157_s26 = int_to_ptr.vmem [resolvable:$true] %s1013_s26 }
  0xa3   : > { %v1290_v8 = vpack.c.bf16 %v418_v6, %v416_v5  ;;  %v420_v11 = vld [vmem:[#allocation5 + $0x48] sm:$0xff]  ;;  %1287 = vmatprep.subr.bf16.mxu0 %v1286_v3  ;;  %v422_v12 = vld [vmem:[#allocation5 + $0x58] sm:$0xff]  ;;  %v1292_v13 = vpack.c.bf16 %v417_v10, %v415_v9  ;;  %v419_v15 = vld [vmem:[#allocation5 + $0x40] sm:$0xff]  ;;  %s1738_s22 = scalar_lea.vmem %s2157_s26, 128  ;;  %p2231_p0 = scmp.ne.s32.totalorder %s2222_s23, 0 }
  0xa4   : > { %1289 = vmatpush1.bf16.msra.mxu0 %v1288_v7  ;;  %v1294_v14 = vpack.c.bf16 %v422_v12, %v420_v11  ;;  %v421_v16 = vld [vmem:[#allocation5 + $0x50] sm:$0xff]  ;;  %v424_v17 = vld [vmem:[#allocation5 + $0x68] sm:$0xff]  ;;  %v426_v18 = vld [vmem:[#allocation5 + $0x78] sm:$0xff]  ;;  %p1739_p6 = scmp.ne.s32.totalorder %s2157_s26, %s1738_s22  ;;  %s1826_s15 = smov [#allocation11]  }
  0xa5   : > { %1291 = vmatprep.subr.bf16.mxu0 %v1290_v8  ;;  %v1296_v19 = vpack.c.bf16 %v421_v16, %v419_v15  ;;  %v1298_v20 = vpack.c.bf16 %v426_v18, %v424_v17  ;;  %v423_v21 = vld [vmem:[#allocation5 + $0x60] sm:$0xff]  ;;  %v425_v22 = vld [vmem:[#allocation5 + $0x70] sm:$0xff]  ;;  %v428_v23 = vld [vmem:[#allocation5 + $0x88] sm:$0xff]  ;;  %s1742_s24 = sshll.u32 %s1826_s15, 4  ;;  %s1743_s24 = int_to_ptr.vmem [resolvable:$false] %s1742_s24 }
  0xa6   : > { %v430_v24 = vld [vmem:[#allocation5 + $0x98] sm:$0xff]  ;;  %v1300_v25 = vpack.c.bf16 %v425_v22, %v423_v21  ;;  %v427_v27 = vld [vmem:[#allocation5 + $0x80] sm:$0xff]  ;;  %v429_v28 = vld [vmem:[#allocation5 + $0x90] sm:$0xff]  ;;  %p1740_p2 = pnand %p1739_p6, %p2231_p0  ;;  %s1744_s9 = scalar_lea.vmem %s1743_s24, 256 }
  0xa7   : > { %v1302_v26 = vpack.c.bf16 %v430_v24, %v428_v23  ;;  %v432_v29 = vld [vmem:[#allocation5 + $0xa8] sm:$0xff]  ;;  %v434_v30 = vld [vmem:[#allocation5 + $0xb8] sm:$0xff]  ;;  %v1304_v31 = vpack.c.bf16 %v429_v28, %v427_v27  ;;  %v431_v33 = vld [vmem:[#allocation5 + $0xa0] sm:$0xff]  ;;  %s2155_s19 = scalar_lea.hbm %s2230_s18, %s1143_s13  ;;  %p1745_p10 = scmp.lt.s32.totalorder %s2157_s26, %s1743_s24 }
  0xa8   : > { %1293 = vmatpush1.bf16.msra.mxu0 %v1292_v13  ;;  %v1306_v32 = vpack.c.bf16 %v434_v30, %v432_v29  ;;  %v433_v34 = vld [vmem:[#allocation5 + $0xb0] sm:$0xff]  ;;  %v436_v35 = vld [vmem:[#allocation5 + $0xc8] sm:$0xff]  ;;  %v438_v36 = vld [vmem:[#allocation5 + $0xd8] sm:$0xff]  ;;  %p1741_p5 = pneg %p1740_p2  ;;  %p1746_p1 = scmp.lt.s32.totalorder %s1744_s9, %s1738_s22 }
  0xa9   : > { %1295 = vmatprep.subr.bf16.mxu0 %v1294_v14  ;;  %v1308_v37 = vpack.c.bf16 %v433_v34, %v431_v33  ;;  %v1310_v38 = vpack.c.bf16 %v438_v36, %v436_v35  ;;  %v435_v39 = vld [vmem:[#allocation5 + $0xc0] sm:$0xff]  ;;  %v437_v40 = vld [vmem:[#allocation5 + $0xd0] sm:$0xff]  ;;  %v408_v41 = vld [vmem:[%s2102_s21 + $0x8] sm:$0xff] }
  0xaa   : > { %v440_v42 = vld [vmem:[#allocation5 + $0xe8] sm:$0xff]  ;;  %v442_v43 = vld [vmem:[#allocation5 + $0xf8] sm:$0xff]  ;;  %615 = vmatprep.mubr.f32.mxu0 %v408_v41  ;;  %v1312_v44 = vpack.c.bf16 %v437_v40, %v435_v39  ;;  %v439_v46 = vld [vmem:[#allocation5 + $0xe0] sm:$0xff]  ;;  %p1747_p11 = por %p1746_p1, %p1745_p10 }
  0xab   : > { %v1314_v45 = vpack.c.bf16 %v442_v43, %v440_v42  ;;  %v441_v47 = vld [vmem:[#allocation5 + $0xf0] sm:$0xff]  ;;  %v444_v48 = vld [vmem:[#allocation5 + $0x108] sm:$0xff]  ;;  %v446_v49 = vld [vmem:[#allocation5 + $0x118] sm:$0xff] }
  0xac   : > { %1297 = vmatpush1.bf16.msra.mxu0 %v1296_v19  ;;  %v1316_v50 = vpack.c.bf16 %v441_v47, %v439_v46  ;;  %v1318_v51 = vpack.c.bf16 %v446_v49, %v444_v48  ;;  %v443_v52 = vld [vmem:[#allocation5 + $0x100] sm:$0xff]  ;;  %v445_v53 = vld [vmem:[#allocation5 + $0x110] sm:$0xff]  ;;  %v448_v54 = vld [vmem:[#allocation5 + $0x128] sm:$0xff]  ;;  %p1748_p12 = pnand %p1747_p11, %p1741_p5 }
  0xad   : > { %1299 = vmatprep.subr.bf16.mxu0 %v1298_v20  ;;  %v450_v55 = vld [vmem:[#allocation5 + $0x138] sm:$0xff]  ;;  %v1320_v56 = vpack.c.bf16 %v445_v53, %v443_v52  ;;  %v447_v58 = vld [vmem:[#allocation5 + $0x120] sm:$0xff]  ;;  %v449_v59 = vld [vmem:[#allocation5 + $0x130] sm:$0xff] }
  0xae   : > { %v1322_v57 = vpack.c.bf16 %v450_v55, %v448_v54  ;;  %v452_v60 = vld [vmem:[#allocation5 + $0x148] sm:$0xff]  ;;  %v454_v61 = vld [vmem:[#allocation5 + $0x158] sm:$0xff]  ;;  %v1324_v62 = vpack.c.bf16 %v449_v59, %v447_v58  ;;  %v451_v0 = vld [vmem:[#allocation5 + $0x140] sm:$0xff] }
  0xaf   : > { %v1326_v63 = vpack.c.bf16 %v454_v61, %v452_v60  ;;  %v453_v1 = vld [vmem:[#allocation5 + $0x150] sm:$0xff]  ;;  %v456_v2 = vld [vmem:[#allocation5 + $0x168] sm:$0xff]  ;;  %v458_v3 = vld [vmem:[#allocation5 + $0x178] sm:$0xff] }
  0xb0   : > { %1301 = vmatpush1.bf16.msra.mxu0 %v1300_v25  ;;  %v1328_v4 = vpack.c.bf16 %v453_v1, %v451_v0  ;;  %v1330_v5 = vpack.c.bf16 %v458_v3, %v456_v2  ;;  %v455_v6 = vld [vmem:[#allocation5 + $0x160] sm:$0xff]  ;;  %v457_v7 = vld [vmem:[#allocation5 + $0x170] sm:$0xff]  ;;  %v460_v8 = vld [vmem:[#allocation5 + $0x188] sm:$0xff] }
  0xb1   : > { %1303 = vmatprep.subr.bf16.mxu0 %v1302_v26  ;;  %v462_v9 = vld [vmem:[#allocation5 + $0x198] sm:$0xff]  ;;  %v459_v10 = vld [vmem:[#allocation5 + $0x180] sm:$0xff]  ;;  %v461_v11 = vld [vmem:[#allocation5 + $0x190] sm:$0xff]  ;;  %v1332_v12 = vpack.c.bf16 %v457_v7, %v455_v6 }
  0xb2   : > { %v464_v13 = vld [vmem:[#allocation5 + $0x1a8] sm:$0xff]  ;;  %v466_v14 = vld [vmem:[#allocation5 + $0x1b8] sm:$0xff]  ;;  %v711_v15 = vld [vmem:[#allocation7 + $0x80] sm:$0xff]  ;;  %v1334_v18 = vpack.c.bf16 %v462_v9, %v460_v8  ;;  %v1336_v29 = vpack.c.bf16 %v461_v11, %v459_v10 }
  0xb3   : > { %v712_v16 = vld [vmem:[#allocation7 + $0x88] sm:$0xff]  ;;  %v695_v17 = vld [vmem:[#allocation7] sm:$0xff]  ;;  %v713_v21 = vld [vmem:[#allocation7 + $0x90] sm:$0xff]  ;;  %v1338_v33 = vpack.c.bf16 %v466_v14, %v464_v13 }
  0xb4   : > { %1305 = vmatpush1.bf16.msra.mxu0 %v1304_v31  ;;  %v1414_v19 = vpack.c.bf16 %v712_v16, %v711_v15  ;;  %v696_v20 = vld [vmem:[#allocation7 + $0x8] sm:$0xff]  ;;  %v714_v22 = vld [vmem:[#allocation7 + $0x98] sm:$0xff]  ;;  %v697_v25 = vld [vmem:[#allocation7 + $0x10] sm:$0xff] }
  0xb5   : > { %1307 = vmatprep.subr.bf16.mxu0 %v1306_v32  ;;  %v1416_v23 = vpack.c.bf16 %v696_v20, %v695_v17  ;;  %v1418_v24 = vpack.c.bf16 %v714_v22, %v713_v21  ;;  %v698_v26 = vld [vmem:[#allocation7 + $0x18] sm:$0xff]  ;;  %v715_v27 = vld [vmem:[#allocation7 + $0xa0] sm:$0xff]  ;;  %v716_v28 = vld [vmem:[#allocation7 + $0xa8] sm:$0xff] }
  0xb6   : > { %1415 = vmatprep.subr.bf16.mxu1 %v1414_v19  ;;  %v463_v30 = vld [vmem:[#allocation5 + $0x1a0] sm:$0xff]  ;;  %v465_v31 = vld [vmem:[#allocation5 + $0x1b0] sm:$0xff]  ;;  %v1420_v32 = vpack.c.bf16 %v698_v26, %v697_v25  ;;  %v468_v34 = vld [vmem:[#allocation5 + $0x1c8] sm:$0xff]  ;;  %v1422_v35 = vpack.c.bf16 %v716_v28, %v715_v27 }
  0xb7   : > { %1417 = vmatpush3.bf16.msra.mxu1 %v1416_v23  ;;  %v699_v36 = vld [vmem:[#allocation7 + $0x20] sm:$0xff]  ;;  %v717_v39 = vld [vmem:[#allocation7 + $0xb0] sm:$0xff]  ;;  %v718_v40 = vld [vmem:[#allocation7 + $0xb8] sm:$0xff]  ;;  %v1340_v41 = vpack.c.bf16 %v465_v31, %v463_v30 }
  0xb8   : > { %1309 = vmatpush1.bf16.msra.mxu0 %v1308_v37  ;;  %1419 = vmatprep.subr.bf16.mxu1 %v1418_v24  ;;  %v700_v37 = vld [vmem:[#allocation7 + $0x28] sm:$0xff]  ;;  %v467_v42 = vld [vmem:[#allocation5 + $0x1c0] sm:$0xff]  ;;  %v469_v43 = vld [vmem:[#allocation5 + $0x1d0] sm:$0xff]  ;;  %v1426_v47 = vpack.c.bf16 %v718_v40, %v717_v39 }
  0xb9   : > { %1311 = vmatprep.subr.bf16.mxu0 %v1310_v38  ;;  %v470_v38 = vld [vmem:[#allocation5 + $0x1d8] sm:$0xff]  ;;  %v472_v46 = vld [vmem:[#allocation5 + $0x1e8] sm:$0xff]  ;;  %v701_v48 = vld [vmem:[#allocation7 + $0x30] sm:$0xff]  ;;  %v1344_v53 = vpack.c.bf16 %v469_v43, %v467_v42 }
  0xba   : > { %v702_v49 = vld [vmem:[#allocation7 + $0x38] sm:$0xff]  ;;  %v720_v52 = vld [vmem:[#allocation7 + $0xc8] sm:$0xff]  ;;  %v471_v54 = vld [vmem:[#allocation5 + $0x1e0] sm:$0xff] }
  0xbb   : > { %1421 = vmatpush3.bf16.msra.mxu1 %v1420_v32  ;;  %v473_v55 = vld [vmem:[#allocation5 + $0x1f0] sm:$0xff]  ;;  %v476_v58 = vld [vmem:[#allocation5 + $0x208] sm:$0xff]  ;;  %v703_v60 = vld [vmem:[#allocation7 + $0x40] sm:$0xff] }
  0xbc   : > { %1313 = vmatpush1.bf16.msra.mxu0 %v1312_v44  ;;  %v1424_v44 = vpack.c.bf16 %v700_v37, %v699_v36  ;;  %1423 = vmatprep.subr.bf16.mxu1 %v1422_v35  ;;  %v704_v61 = vld [vmem:[#allocation7 + $0x48] sm:$0xff]  ;;  %v722_v0 = vld [vmem:[#allocation7 + $0xd8] sm:$0xff]  ;;  %v1348_v1 = vpack.c.bf16 %v473_v55, %v471_v54  ;;  %v705_v9 = vld [vmem:[#allocation7 + $0x50] sm:$0xff] }
  0xbd   : > { %1315 = vmatprep.subr.bf16.mxu0 %v1314_v45  ;;  %v1342_v45 = vpack.c.bf16 %v470_v38, %v468_v34  ;;  %v1432_v2 = vpack.c.bf16 %v704_v61, %v703_v60  ;;  %v480_v6 = vld [vmem:[#allocation5 + $0x228] sm:$0xff]  ;;  %v482_v8 = vld [vmem:[#allocation5 + $0x238] sm:$0xff]  ;;  %v723_v11 = vld [vmem:[#allocation7 + $0xe0] sm:$0xff] }
  0xbe   : > { %v706_v10 = vld [vmem:[#allocation7 + $0x58] sm:$0xff]  ;;  %v407_v13 = vld [vmem:[%s2102_s21] sm:$0xff]  ;;  %v1354_v15 = vpack.c.bf16 %v482_v8, %v480_v6  ;;  %v481_v17 = vld [vmem:[#allocation5 + $0x230] sm:$0xff] }
  0xbf   : > { %1425 = vmatpush3.bf16.msra.mxu1 %v1424_v44  ;;  %v479_v16 = vld [vmem:[#allocation5 + $0x220] sm:$0xff]  ;;  %v1436_v19 = vpack.c.bf16 %v706_v10, %v705_v9  ;;  %v484_v20 = vld [vmem:[#allocation5 + $0x248] sm:$0xff]  ;;  %v486_v21 = vld [vmem:[#allocation5 + $0x258] sm:$0xff] }
  0xc0   : > { %1317 = vmatpush1.bf16.msra.mxu0 %v1316_v50  ;;  %v474_v50 = vld [vmem:[#allocation5 + $0x1f8] sm:$0xff]  ;;  %1427 = vmatprep.subr.bf16.mxu1 %v1426_v47  ;;  %v1356_v23 = vpack.c.bf16 %v481_v17, %v479_v16  ;;  %v1358_v24 = vpack.c.bf16 %v486_v21, %v484_v20  ;;  %v483_v25 = vld [vmem:[#allocation5 + $0x240] sm:$0xff]  ;;  %v485_v26 = vld [vmem:[#allocation5 + $0x250] sm:$0xff] }
  0xc1   : > { %1319 = vmatprep.subr.bf16.mxu0 %v1318_v51  ;;  %v719_v51 = vld [vmem:[#allocation7 + $0xc0] sm:$0xff]  ;;  %v488_v27 = vld [vmem:[#allocation5 + $0x268] sm:$0xff]  ;;  %v490_v28 = vld [vmem:[#allocation5 + $0x278] sm:$0xff] }
  0xc2   : > { %v1430_v59 = vpack.c.bf16 %v720_v52, %v719_v51  ;;  %v1362_v30 = vpack.c.bf16 %v490_v28, %v488_v27  ;;  %v487_v31 = vld [vmem:[#allocation5 + $0x260] sm:$0xff]  ;;  %v489_v32 = vld [vmem:[#allocation5 + $0x270] sm:$0xff]  ;;  %v494_v34 = vld [vmem:[#allocation5 + $0x298] sm:$0xff] }
  0xc3   : > { %v1364_v35 = vpack.c.bf16 %v489_v32, %v487_v31  ;;  %v491_v37 = vld [vmem:[#allocation5 + $0x280] sm:$0xff]  ;;  %v493_v38 = vld [vmem:[#allocation5 + $0x290] sm:$0xff]  ;;  %v496_v39 = vld [vmem:[#allocation5 + $0x2a8] sm:$0xff] }
  0xc4   : > { %1321 = vmatpush1.bf16.msra.mxu0 %v1320_v56  ;;  %v1428_v56 = vpack.c.bf16 %v702_v49, %v701_v48  ;;  %v498_v40 = vld [vmem:[#allocation5 + $0x2b8] sm:$0xff]  ;;  %v495_v43 = vld [vmem:[#allocation5 + $0x2a0] sm:$0xff]  ;;  %v497_v44 = vld [vmem:[#allocation5 + $0x2b0] sm:$0xff] }
  0xc5   : > { %1323 = vmatprep.subr.bf16.mxu0 %v1322_v57  ;;  %v1346_v57 = vpack.c.bf16 %v474_v50, %v472_v46  ;;  %v1370_v42 = vpack.c.bf16 %v498_v40, %v496_v39  ;;  %v502_v46 = vld [vmem:[#allocation5 + $0x2d8] sm:$0xff]  ;;  %v1372_v47 = vpack.c.bf16 %v497_v44, %v495_v43  ;;  %v499_v49 = vld [vmem:[#allocation5 + $0x2c0] sm:$0xff]  ;;  %v501_v50 = vld [vmem:[#allocation5 + $0x2d0] sm:$0xff] }
  0xc6   : > { %1429 = vmatpush3.bf16.msra.mxu1 %v1428_v56  ;;  %v504_v51 = vld [vmem:[#allocation5 + $0x2e8] sm:$0xff]  ;;  %v506_v52 = vld [vmem:[#allocation5 + $0x2f8] sm:$0xff]  ;;  %v503_v55 = vld [vmem:[#allocation5 + $0x2e0] sm:$0xff] }
  0xc7   : > { %1431 = vmatprep.subr.bf16.mxu1 %v1430_v59  ;;  %v1378_v54 = vpack.c.bf16 %v506_v52, %v504_v51  ;;  %v505_v56 = vld [vmem:[#allocation5 + $0x2f0] sm:$0xff]  ;;  %v507_v61 = vld [vmem:[#allocation5 + $0x300] sm:$0xff]  ;;  %v518_v6 = vld [vmem:[#allocation5 + $0x358] sm:$0xff]  ;;  %v1823_v52 = vmov 0.0|0.0  }
  0xc8   : > { %1325 = vmatpush1.bf16.msra.mxu0 %v1324_v62  ;;  %v478_v62 = vld [vmem:[#allocation5 + $0x218] sm:$0xff]  ;;  %v1380_v59 = vpack.c.bf16 %v505_v56, %v503_v55  ;;  %v515_v9 = vld [vmem:[#allocation5 + $0x340] sm:$0xff]  ;;  %v517_v10 = vld [vmem:[#allocation5 + $0x350] sm:$0xff] }
  0xc9   : > { %1327 = vmatprep.subr.bf16.mxu0 %v1326_v63  ;;  %v721_v63 = vld [vmem:[#allocation7 + $0xd0] sm:$0xff]  ;;  %v1350_v3 = vpack.c.bf16 %v478_v62, %v476_v58  ;;  %v510_v58 = vld [vmem:[#allocation5 + $0x318] sm:$0xff]  ;;  %v524_v17 = vld [vmem:[#allocation5 + $0x388] sm:$0xff] }
  0xca   : > { %v1434_v7 = vpack.c.bf16 %v722_v0, %v721_v63  ;;  %1433 = vmatpush3.bf16.msra.mxu1 %v1432_v2  ;;  %v509_v62 = vld [vmem:[#allocation5 + $0x310] sm:$0xff]  ;;  %v512_v63 = vld [vmem:[#allocation5 + $0x328] sm:$0xff]  ;;  %v514_v0 = vld [vmem:[#allocation5 + $0x338] sm:$0xff] }
  0xcb   : > { %v1386_v2 = vpack.c.bf16 %v514_v0, %v512_v63  ;;  %v521_v16 = vld [vmem:[#allocation5 + $0x370] sm:$0xff]  ;;  %v523_v21 = vld [vmem:[#allocation5 + $0x380] sm:$0xff]  ;;  %v708_v44 = vld [vmem:[#allocation7 + $0x68] sm:$0xff] }
  0xcc   : > { %1329 = vmatpush1.bf16.msra.mxu0 %v1328_v4  ;;  %v475_v4 = vld [vmem:[#allocation5 + $0x200] sm:$0xff]  ;;  %1435 = vmatprep.subr.bf16.mxu1 %v1434_v7  ;;  %v529_v28 = vld [vmem:[#allocation5 + $0x3b0] sm:$0xff]  ;;  %v806_v0 = vld [vmem:[#allocation8 + $0x8] sm:$0xff] }
  0xcd   : > { %1331 = vmatprep.subr.bf16.mxu0 %v1330_v5  ;;  %v477_v5 = vld [vmem:[#allocation5 + $0x210] sm:$0xff]  ;;  %v527_v27 = vld [vmem:[#allocation5 + $0x3a0] sm:$0xff] }
  0xce   : > { %v1352_v14 = vpack.c.bf16 %v477_v5, %v475_v4  ;;  %1437 = vmatpush3.bf16.msra.mxu1 %v1436_v19  ;;  %v513_v4 = vld [vmem:[#allocation5 + $0x330] sm:$0xff]  ;;  %v516_v5 = vld [vmem:[#allocation5 + $0x348] sm:$0xff]  ;;  %v1404_v31 = vpack.c.bf16 %v529_v28, %v527_v27  ;;  %v535_v39 = vld [vmem:[#allocation5 + $0x3e0] sm:$0xff] }
  0xcf   : > { %v1390_v8 = vpack.c.bf16 %v518_v6, %v516_v5  ;;  %v537_v40 = vld [vmem:[#allocation5 + $0x3f0] sm:$0xff]  ;;  %v707_v43 = vld [vmem:[#allocation7 + $0x60] sm:$0xff]  ;;  %v808_v6 = vld [vmem:[#allocation8 + $0x18] sm:$0xff] }
  0xd0   : > { %1333 = vmatpush1.bf16.msra.mxu0 %v1332_v12  ;;  %v724_v12 = vld [vmem:[#allocation7 + $0xe8] sm:$0xff]  ;;  %v539_v56 = vld [vmem:[%s2201_s2] sm:$0x3]  ;;  %v807_v5 = vld [vmem:[#allocation8 + $0x10] sm:$0xff] }
  0xd1   : > { %1335 = vmatprep.subr.bf16.mxu0 %v1334_v18  ;;  %v410_v18 = vld [vmem:[%s2102_s21 + $0x18] sm:$0xff]  ;;  %v1438_v22 = vpack.c.bf16 %v724_v12, %v723_v11  ;;  %v520_v11 = vld [vmem:[#allocation5 + $0x368] sm:$0xff]  ;;  %v805_v63 = vld [vmem:[#allocation8] sm:$0xff] }
  0xd2   : > { %v522_v12 = vld [vmem:[#allocation5 + $0x378] sm:$0xff]  ;;  %v1138_v28 = vld [vmem:[%s2203_s4] ss:$0 sm:$0xff] }
  0xd3   : > { %1439 = vmatprep.subr.bf16.mxu1 %v1438_v22  ;;  %v525_v22 = vld [vmem:[#allocation5 + $0x390] sm:$0xff] }
  0xd4   : > { %1337 = vmatpush1.bf16.msra.mxu0 %v1336_v29  ;;  %v1360_v29 = vpack.c.bf16 %v485_v26, %v483_v25  ;;  %v1400_v25 = vpack.c.bf16 %v525_v22, %v523_v21  ;;  %v818_v21 = vld [vmem:[#allocation8 + $0x68] sm:$0xff] }
  0xd5   : > { %1339 = vmatprep.subr.bf16.mxu0 %v1338_v33  ;;  %v492_v33 = vld [vmem:[#allocation5 + $0x288] sm:$0xff] }
  0xd6   : > { %v1366_v36 = vpack.c.bf16 %v494_v34, %v492_v33  ;;  %v531_v33 = vld [vmem:[#allocation5 + $0x3c0] sm:$0xff]  ;;  %v533_v34 = vld [vmem:[#allocation5 + $0x3d0] sm:$0xff] }
  0xd8   : > { %1341 = vmatpush1.bf16.msra.mxu0 %v1340_v41  ;;  %v1368_v41 = vpack.c.bf16 %v493_v38, %v491_v37  ;;  %v1408_v37 = vpack.c.bf16 %v533_v34, %v531_v33 }
  0xd9   : > { %1343 = vmatprep.subr.bf16.mxu0 %v1342_v45  ;;  %v500_v45 = vld [vmem:[#allocation5 + $0x2c8] sm:$0xff] }
  0xda   : > { %v1374_v48 = vpack.c.bf16 %v502_v46, %v500_v45  ;;  %v1440_v45 = vpack.c.bf16 %v708_v44, %v707_v43  ;;  %v725_v46 = vld [vmem:[#allocation7 + $0xf0] sm:$0xff]  ;;  %v906_v43 = vld [vmem:[#allocation10 + $0x38] sm:$0xff] }
  0xdc   : > { %1345 = vmatpush1.bf16.msra.mxu0 %v1344_v53  ;;  %v1376_v53 = vpack.c.bf16 %v501_v50, %v499_v49  ;;  %1441 = vmatpush3.bf16.msra.mxu1 %v1440_v45  ;;  %v709_v49 = vld [vmem:[#allocation7 + $0x70] sm:$0xff]  ;;  %v710_v50 = vld [vmem:[#allocation7 + $0x78] sm:$0xff]  ;;  %v907_v45 = vld [vmem:[#allocation10 + $0x40] sm:$0xff] }
  0xdd   : > { %1347 = vmatprep.subr.bf16.mxu0 %v1346_v57  ;;  %v508_v57 = vld [vmem:[#allocation5 + $0x308] sm:$0xff]  ;;  %v1444_v51 = vpack.c.bf16 %v710_v50, %v709_v49  ;;  %v910_v49 = vld [vmem:[#allocation10 + $0x58] sm:$0xff] }
  0xde   : > { %v1382_v60 = vpack.c.bf16 %v510_v58, %v508_v57 }
  0xe0   : > { %1349 = vmatpush1.bf16.msra.mxu0 %v1348_v1  ;;  %v1384_v1 = vpack.c.bf16 %v509_v62, %v507_v61 }
  0xe1   : > { %1351 = vmatprep.subr.bf16.mxu0 %v1350_v3  ;;  %v511_v3 = vld [vmem:[#allocation5 + $0x320] sm:$0xff] }
  0xe2   : > { %v1388_v7 = vpack.c.bf16 %v513_v4, %v511_v3  ;;  %v1447_v3 = vpack.c.bf16 %v806_v0, %v805_v63  ;;  %v1140_v63 = vld [vmem:[%s2207_s8] ss:$0 sm:$0xff] }
  0xe3   : > { %616 = vmatmul.mubr.f32.vlgmr.msra.gmra.mrb[0].mxu0 %v407_v13  ;;  %v1392_v13 = vpack.c.bf16 %v517_v10, %v515_v9  ;;  %v810_v9 = vld [vmem:[#allocation8 + $0x28] sm:$0xff] }
  0xe4   : > { %1353 = vmatpush1.bf16.msra.mxu0 %v1352_v14  ;;  %686 = vmatprep.mubr.f32.mxu0 %v410_v18  ;;  %v1394_v14 = vpack.c.bf16 %v522_v12, %v520_v11  ;;  %v526_v18 = vld [vmem:[#allocation5 + $0x398] sm:$0xff]  ;;  %v811_v11 = vld [vmem:[#allocation8 + $0x30] sm:$0xff] }
  0xe5   : > { %1355 = vmatprep.subr.bf16.mxu0 %v1354_v15  ;;  %v519_v15 = vld [vmem:[#allocation5 + $0x360] sm:$0xff]  ;;  %v1398_v20 = vpack.c.bf16 %v526_v18, %v524_v17  ;;  %v812_v12 = vld [vmem:[#allocation8 + $0x38] sm:$0xff]  ;;  %v815_v17 = vld [vmem:[#allocation8 + $0x50] sm:$0xff] }
  0xe6   : > { %v1396_v19 = vpack.c.bf16 %v521_v16, %v519_v15  ;;  %v814_v15 = vld [vmem:[#allocation8 + $0x48] sm:$0xff]  ;;  %v816_v18 = vld [vmem:[#allocation8 + $0x58] sm:$0xff] }
  0xe8   : > { %1357 = vmatpush1.bf16.msra.mxu0 %v1356_v23  ;;  %v528_v23 = vld [vmem:[#allocation5 + $0x3a8] sm:$0xff] }
  0xe9   : > { %1359 = vmatprep.subr.bf16.mxu0 %v1358_v24  ;;  %v530_v24 = vld [vmem:[#allocation5 + $0x3b8] sm:$0xff] }
  0xea   : > { %v1402_v26 = vpack.c.bf16 %v530_v24, %v528_v23  ;;  %v819_v23 = vld [vmem:[#allocation8 + $0x70] sm:$0xff]  ;;  %v820_v24 = vld [vmem:[#allocation8 + $0x78] sm:$0xff] }
  0xec   : > { %1361 = vmatpush1.bf16.msra.mxu0 %v1360_v29  ;;  %v532_v29 = vld [vmem:[#allocation5 + $0x3c8] sm:$0xff] }
  0xed   : > { %1363 = vmatprep.subr.bf16.mxu0 %v1362_v30  ;;  %v534_v30 = vld [vmem:[#allocation5 + $0x3d8] sm:$0xff] }
  0xee   : > { %v1406_v32 = vpack.c.bf16 %v534_v30, %v532_v29 }
  0xf0   : > { %1365 = vmatpush1.bf16.msra.mxu0 %v1364_v35  ;;  %v536_v35 = vld [vmem:[#allocation5 + $0x3e8] sm:$0xff] }
  0xf1   : > { %1367 = vmatprep.subr.bf16.mxu0 %v1366_v36  ;;  %v538_v36 = vld [vmem:[#allocation5 + $0x3f8] sm:$0xff] }
  0xf2   : > { %v1410_v38 = vpack.c.bf16 %v538_v36, %v536_v35  ;;  %v901_v36 = vld [vmem:[#allocation10 + $0x10] sm:$0xff] }
  0xf4   : > { %1369 = vmatpush1.bf16.msra.mxu0 %v1368_v41  ;;  %v1412_v41 = vpack.c.bf16 %v537_v40, %v535_v39  ;;  %v903_v39 = vld [vmem:[#allocation10 + $0x20] sm:$0xff]  ;;  %v904_v40 = vld [vmem:[#allocation10 + $0x28] sm:$0xff] }
  0xf5   : > { %1371 = vmatprep.subr.bf16.mxu0 %v1370_v42  ;;  %v409_v42 = vld [vmem:[%s2102_s21 + $0x10] sm:$0xff] }
  0xf8   : > { %1373 = vmatpush1.bf16.msra.mxu0 %v1372_v47  ;;  %v726_v47 = vld [vmem:[#allocation7 + $0xf8] sm:$0xff] }
  0xf9   : > { %1375 = vmatprep.subr.bf16.mxu0 %v1374_v48  ;;  %v1442_v48 = vpack.c.bf16 %v726_v47, %v725_v46  ;;  %v908_v46 = vld [vmem:[#allocation10 + $0x48] sm:$0xff] }
  0xfa   : > { %v1483_v47 = vpack.c.bf16 %v908_v46, %v907_v45 }
  0xfb   : > { %1443 = vmatprep.subr.bf16.mxu1 %v1442_v48  ;;  %v909_v48 = vld [vmem:[#allocation10 + $0x50] sm:$0xff] }
  0xfc   : > { %1377 = vmatpush1.bf16.msra.mxu0 %v1376_v53  ;;  %1445 = vmatpush3.bf16.msra.mxu1 %v1444_v51  ;;  %v541_v53 = vlaneseq  ;;  %v1486_v50 = vpack.c.bf16 %v910_v49, %v909_v48  ;;  %v911_v51 = vld [vmem:[#allocation10 + $0x60] sm:$0xff] }
  0xfd   : > { %1379 = vmatprep.subr.bf16.mxu0 %v1378_v54  ;;  %1446 = vmatprep.subr.bf16.mxu1 %v1823_v52 }
  0xfe   : > { %v542_v54 = vshrl.u32 %v541_v53, 7  ;;  %v912_v53 = vld [vmem:[#allocation10 + $0x68] sm:$0xff] }
 0x100   : > { %1381 = vmatpush1.bf16.msra.mxu0 %v1380_v59  ;;  %v543_v55 = vsub.s32 0, %v542_v54  ;;  %v547_v57 = vsub.s32 1, %v542_v54  ;;  %v1489_v54 = vpack.c.bf16 %v912_v53, %v911_v51 }
 0x101   : > { %1383 = vmatprep.subr.bf16.mxu0 %v1382_v60 }
 0x102   : > { %v544_v58 = vrot.slane %v539_v56, %v543_v55  ;;  %v548_v59 = vrot.slane %v539_v56, %v547_v57  ;;  %v913_v55 = vld [vmem:[#allocation10 + $0x70] sm:$0xff]  ;;  %v914_v56 = vld [vmem:[#allocation10 + $0x78] sm:$0xff] }
 0x103   : > { %v1492_v57 = vpack.c.bf16 %v914_v56, %v913_v55 }
 0x104   : > { %1385 = vmatpush1.bf16.msra.mxu0 %v1384_v1 }
 0x105   : > { %1387 = vmatprep.subr.bf16.mxu0 %v1386_v2 }
 0x108   : > { %1389 = vmatpush1.bf16.msra.mxu0 %v1388_v7  ;;  %v1450_v7 = vpack.c.bf16 %v808_v6, %v807_v5 }
 0x109   : > { %1391 = vmatprep.subr.bf16.mxu0 %v1390_v8  ;;  %v809_v8 = vld [vmem:[#allocation8 + $0x20] sm:$0xff] }
 0x10a   : > { %v1453_v10 = vpack.c.bf16 %v810_v9, %v809_v8 }
 0x10c   : > { %1393 = vmatpush1.bf16.msra.mxu0 %v1392_v13  ;;  %v1456_v13 = vpack.c.bf16 %v812_v12, %v811_v11 }
 0x10d   : > { %1395 = vmatprep.subr.bf16.mxu0 %v1394_v14  ;;  %v813_v14 = vld [vmem:[#allocation8 + $0x40] sm:$0xff] }
 0x10e   : > { %v1459_v16 = vpack.c.bf16 %v814_v15, %v813_v14 }
 0x110   : > { %1397 = vmatpush1.bf16.msra.mxu0 %v1396_v19  ;;  %v1462_v19 = vpack.c.bf16 %v816_v18, %v815_v17 }
 0x111   : > { %1399 = vmatprep.subr.bf16.mxu0 %v1398_v20  ;;  %v817_v20 = vld [vmem:[#allocation8 + $0x60] sm:$0xff] }
 0x112   : > { %v1465_v22 = vpack.c.bf16 %v818_v21, %v817_v20 }
 0x114   : > { %1401 = vmatpush1.bf16.msra.mxu0 %v1400_v25  ;;  %v1468_v25 = vpack.c.bf16 %v820_v24, %v819_v23 }
 0x115   : > { %1403 = vmatprep.subr.bf16.mxu0 %v1402_v26  ;;  %v1825_v26 = vmov 0.0  }
 0x118   : > { %1405 = vmatpush1.bf16.msra.mxu0 %v1404_v31  ;;  %v899_v31 = vld [vmem:[#allocation10] sm:$0xff] }
 0x119   : > { %1407 = vmatprep.subr.bf16.mxu0 %v1406_v32  ;;  %v900_v32 = vld [vmem:[#allocation10 + $0x8] sm:$0xff] }
 0x11a   : > { %v1471_v34 = vpack.c.bf16 %v900_v32, %v899_v31 }
 0x11c   : > { %1409 = vmatpush1.bf16.msra.mxu0 %v1408_v37  ;;  %v902_v37 = vld [vmem:[#allocation10 + $0x18] sm:$0xff] }
 0x11d   : > { %1411 = vmatprep.subr.bf16.mxu0 %v1410_v38  ;;  %v1474_v38 = vpack.c.bf16 %v902_v37, %v901_v36 }
 0x120   : > { %1413 = vmatpush1.bf16.msra.mxu0 %v1412_v41  ;;  %v1477_v41 = vpack.c.bf16 %v904_v40, %v903_v39 }
 0x123   : > { %687 = vmatmul.mubr.f32.vlgmr.msra.gmra.mrb[0].mxu0 %v409_v42  ;;  %v905_v42 = vld [vmem:[#allocation10 + $0x30] sm:$0xff] }
 0x124   : > { %v1480_v44 = vpack.c.bf16 %v906_v43, %v905_v42 }
 0x1f6   : > { %v688_v60 = vpop.f32.mrb[0].mxu0 }
 0x1f7   : > { %v1494_v61 = vadd.f32 %v688_v60, %v544_v58  ;;  %v690_v62 = vpop.f32.mrb[1].mxu0  ;;  %v1139_v58 = vld [vmem:[%s2205_s6] ss:$0 sm:$0xff] }
 0x1f8   : > { %v1495_v1 = vadd.f32 %v690_v62, %v548_v59 }
 0x1f9   : > { %v693_v4 = vmax.f32 %v1494_v61, 0.0 }
 0x1fa   : > { %v694_v2 = vmax.f32 %v1495_v1, 0.0 }
 0x1fc   : > { %798 = vmatprep.mubr.f32.mxu1 %v694_v2 }
 0x1fd   : > { %799 = vmatmul.mubr.f32.vlgmr.msra.gmra.mrb[0].mxu1 %v693_v4 }
 0x1fe   : > { %1448 = vmatpush3.bf16.msra.mxu1 %v1447_v3  ;;  %1248 = vmatprep.mubr.msk.f32.mxu1 %vm1824_vm0, %v1825_v26 }
 0x1ff   : > { %1449 = vmatprep.subr.bf16.mxu1 %v1823_v52 }
 0x202   : > { %1451 = vmatpush3.bf16.msra.mxu1 %v1450_v7 }
 0x203   : > { %1452 = vmatprep.subr.bf16.mxu1 %v1823_v52 }
 0x206   : > { %1454 = vmatpush3.bf16.msra.mxu1 %v1453_v10 }
 0x207   : > { %1455 = vmatprep.subr.bf16.mxu1 %v1823_v52 }
 0x20a   : > { %1457 = vmatpush3.bf16.msra.mxu1 %v1456_v13 }
 0x20b   : > { %1458 = vmatprep.subr.bf16.mxu1 %v1823_v52 }
 0x20e   : > { %1460 = vmatpush3.bf16.msra.mxu1 %v1459_v16 }
 0x20f   : > { %1461 = vmatprep.subr.bf16.mxu1 %v1823_v52 }
 0x212   : > { %1463 = vmatpush3.bf16.msra.mxu1 %v1462_v19 }
 0x213   : > { %1464 = vmatprep.subr.bf16.mxu1 %v1823_v52 }
 0x216   : > { %1466 = vmatpush3.bf16.msra.mxu1 %v1465_v22 }
 0x217   : > { %1467 = vmatprep.subr.bf16.mxu1 %v1823_v52 }
 0x21a   : > { %1469 = vmatpush3.bf16.msra.mxu1 %v1468_v25 }
 0x21b   : > { %1470 = vmatprep.subr.bf16.mxu1 %v1823_v52 }
 0x2d0   : > { %v1179_v27 = vpop.f32.mrb[0].mxu1 }
 0x2d1   : > { %v1180_v29 = vpop.f32.mrb[1].mxu1 }
 0x2d2   : > { %v1181_v30 = vadd.f32 %v1180_v29, %v1179_v27 }
 0x2d4   : > { %v801_v33 = vadd.f32 %v1181_v30, %v1138_v28 }
 0x2d6   : > { %v804_v35 = vmax.f32 %v801_v33, 0.0 }
 0x2d8   : > { %1249 = vmatmul.mubr.f32.vlgmr.msra.gmra.mrb[2].mxu1 %v804_v35 }
 0x2d9   : > { %1472 = vmatpush3.bf16.msra.mxu1 %v1471_v34  ;;  %1283 = vmatprep.mubr.msk.f32.mxu1 %vm1824_vm0, %v1825_v26 }
 0x2da   : > { %1473 = vmatprep.subr.bf16.mxu1 %v1823_v52 }
 0x2dd   : > { %1475 = vmatpush3.bf16.msra.mxu1 %v1474_v38 }
 0x2de   : > { %1476 = vmatprep.subr.bf16.mxu1 %v1823_v52 }
 0x2e1   : > { %1478 = vmatpush3.bf16.msra.mxu1 %v1477_v41 }
 0x2e2   : > { %1479 = vmatprep.subr.bf16.mxu1 %v1823_v52 }
 0x2e5   : > { %1481 = vmatpush3.bf16.msra.mxu1 %v1480_v44 }
 0x2e6   : > { %1482 = vmatprep.subr.bf16.mxu1 %v1823_v52 }
 0x2e9   : > { %1484 = vmatpush3.bf16.msra.mxu1 %v1483_v47 }
 0x2ea   : > { %1485 = vmatprep.subr.bf16.mxu1 %v1823_v52 }
 0x2ed   : > { %1487 = vmatpush3.bf16.msra.mxu1 %v1486_v50 }
 0x2ee   : > { %1488 = vmatprep.subr.bf16.mxu1 %v1823_v52 }
 0x2f1   : > { %1490 = vmatpush3.bf16.msra.mxu1 %v1489_v54 }
 0x2f2   : > { %1491 = vmatprep.subr.bf16.mxu1 %v1823_v52 }
 0x2f5   : > { %1493 = vmatpush3.bf16.msra.mxu1 %v1492_v57 }
 0x3ab   : > { %v894_v59 = vpop.f32.mrb[2].mxu1 }
 0x3ac   : > { %v895_v60 = vadd.f32 %v1139_v58, %v894_v59  ;;  %v1250_v61 = vpop.f32.mrb[3].mxu1 }
 0x3ae   : > { %v898_v62 = vmax.f32 %v895_v60, 0.0 }
 0x3b0   : > { %1284 = vmatmul.mubr.f32.vlgmr.msra.gmra.mrb[4].mxu1 %v898_v62 }
 0x483   : > { %v988_v52 = vpop.f32.mrb[4].mxu1 }
 0x484   : > { %v989_v0 = vadd.f32 %v1140_v63, %v988_v52  ;;  %v1285_v1 = vpop.f32.mrb[5].mxu1 }
 0x486   : > { %v1141_v2 = vmul.f32 -1.442695, %v989_v0 }
 0x488   : > { %1592 = vpow2.f32 %v1141_v2 }
 0x492   : > { %v1593_v3 = vpop.eup %1592 }
 0x493   : > { %v995_v4 = vadd.f32 1.0, %v1593_v3 }
 0x495   : > { %1594 = vrcp.f32 %v995_v4 }
 0x49f   : > { %v1595_v5 = vpop.eup %1594 }
 0x4a0   : > { %998 = vst [vmem:[%s406_s14] sm:$0xff] %v1595_v5 }
 0x4a1   : > { %1751 = shalt.err (!%p1748_p12)
}
 0x4a2   : > { %s1752_s1 = scalar_lea.hbm %s2155_s19, 128  ;;  %s1756_s13 = scalar_lea.hbm %s2230_s18, 256 }
 0x4a3   : > { %p1753_p13 = scmp.ne.s32.totalorder %s2155_s19, %s1752_s1  ;;  %p1757_p9 = scmp.lt.u32.totalorder %s2155_s19, %s2230_s18 }
 0x4a4   : > { %p1758_p4 = scmp.lt.u32.totalorder %s1756_s13, %s1752_s1  ;;  %p1760_p6 = scmp.lt.u32.totalorder %s1752_s1, %s2155_s19 }
 0x4a5   : > { %p1754_p3 = pnand %p1753_p13, %p2231_p0 }
 0x4a6   : > { %p1759_p8 = por %p1758_p4, %p1757_p9 }
 0x4a7   : > { %p1755_p7 = pneg %p1754_p3 }
 0x4a8   : > { %p1761_p2 = por %p1760_p6, %p1759_p8 }
 0x4aa   : > { %p1762_p5 = pnand %p1761_p2, %p1755_p7 }
 0x4ac   : > { %1765 = shalt.err (!%p1762_p5)
}
 0x4ad   : > { %1516 = dma.vmem_to_hbm [thread:$0]  (%p2231_p0), %s2157_s26, 128, %s2155_s19, %s1000_s17  }
 0x4ae PF: > { %s1025_s16 = sand.u32 1, %s1800_s30   ;;  %p2232_p10 = scmp.ne.s32.totalorder %s2223_s28, 0 }
 0x4af   : > { %p2233_p1 = scmp.ge.s32.totalorder %s1812_s12, 2  ;;  %s1026_s22 = scalar_lea.sflag [#allocation4], %s1025_s16 }
 0x4b1   : > { %p1536_p11 = pnand %p2233_p1, %p2232_p10 }
 0x4b3   : > { %1795 = dma.done.wait (!%p1536_p11), %s1026_s22, 128  }
 0x4b4   : > { %1797 = vsyncadd (!%p1536_p11), %s1026_s22, 4294967168  ;;  %p24_p12 = scmp.ge.s32.totalorder %s2022_s27, 4   ;;  %s2234_s30 = smov %s1804_s10 }
 0x4b5   : > { %s2235_s10 = smov %s1808_s11  ;;  %s2236_s11 = smov %s2033_s25 }
 0x4b6   : > { %s2237_s12 = smov %s2022_s27  ;;  %26 = sbr.rel (!%p24_p12) target bundleno = 10 (0xa), region = 117 }
 0x4bd   :  { %1031 = vsyncpa [#allocation3], 1 }
 0x4be   :  { %1033 = vsyncpa [#allocation3 + $0x1], 1 }
 0x4bf   :  { %1034 = vsyncpa [#allocation6], 1 }
 0x4c0   :  { %1035 = vsyncpa [#allocation9], 1 }
 0x4c1   :  { %1036 = vsyncpa [#allocation4], 1 }
 0x4c2   :  { %1038 = vsyncpa [#allocation4 + $0x1], 1 }

</bundles_post_ra>
